<compile_context>
chip_gen: v5e
topology: v5e:2x2
jax: 0.10.0
libtpu: 0.0.40
codegen_flags: <defaults>
</compile_context>

<pallas_src>
import functools
import math

import jax
import jax.numpy as jnp
from jax.experimental import pallas as pl
from jax.experimental.pallas import tpu as pltpu


def _round_up(n, m):
    return ((n + m - 1) // m) * m


def _softplus(z):
    # numerically stable softplus: max(z,0) + log1p(exp(-|z|))
    return jnp.maximum(z, 0.0) + jnp.log1p(jnp.exp(-jnp.abs(z)))


def _num_tensorcores():
    """Best-effort TensorCore count query; falls back to 1 (v5e/v6e)."""
    try:
        info = pltpu.get_tpu_info()
        for attr in ("num_cores", "core_count", "num_tensorcores",
                     "tensorcore_count", "num_tensor_cores"):
            v = getattr(info, attr, None)
            if isinstance(v, int) and v > 0:
                return v
    except Exception:
        pass
    return 1


def policy_kernel(xe_ref,                  # (TB, state_dim + action_dim): [x | eps]
                  w1_ref, b1_ref,
                  w2_ref, b2_ref,
                  w3_ref, b3_ref,
                  w4_ref, b4_ref,          # fused head -> [mu | logstd]
                  out_ref,                 # (TB, out_w) slab: action|mean|(logprob)|0
                  *, state_dim, action_dim, get_logprob):
    cdt = w1_ref.dtype                     # matmul operand dtype (f32 or bf16)
    tb, out_w = out_ref.shape

    xe = xe_ref[...]
    x = xe[:, :state_dim]
    eps = xe[:, state_dim:state_dim + action_dim]

    # --- MLPNetwork: (Linear -> ReLU) x3 -> fused output Linear
    h = jnp.dot(x.astype(cdt), w1_ref[...], preferred_element_type=jnp.float32)
    h = jnp.maximum(h + b1_ref[...], 0.0)
    h = jnp.dot(h.astype(cdt), w2_ref[...], preferred_element_type=jnp.float32)
    h = jnp.maximum(h + b2_ref[...], 0.0)
    h = jnp.dot(h.astype(cdt), w3_ref[...], preferred_element_type=jnp.float32)
    h = jnp.maximum(h + b3_ref[...], 0.0)

    head = jnp.dot(h.astype(cdt), w4_ref[...], preferred_element_type=jnp.float32)
    head = head + b4_ref[...]
    mu = head[:, :action_dim]                          # .chunk(2, dim=1)
    logstd = jnp.clip(head[:, action_dim:], -20.0, 2.0)

    # --- tanh-Gaussian head (all f32 elementwise)
    std = jnp.exp(logstd)
    x_raw = mu + std * eps                             # rsample() of base Normal
    action = jnp.tanh(x_raw)                           # TanhTransform._call
    mean = jnp.tanh(mu)

    pieces = [action, mean]
    used = 2 * action_dim
    if get_logprob:
        # Normal(mu, std).log_prob(x_raw) = -0.5*eps^2 - logstd - 0.5*log(2*pi)
        base_lp = -0.5 * eps * eps - logstd - 0.5 * math.log(2.0 * math.pi)
        # TanhTransform.log_abs_det_jacobian(x, y) = 2*(log2 - x - softplus(-2x))
        ladj = 2.0 * (math.log(2.0) - x_raw - _softplus(-2.0 * x_raw))
        logprob = jnp.sum(base_lp - ladj, axis=-1, keepdims=True)
        pieces.append(logprob)
        used += 1

    pad = out_w - used
    if pad > 0:
        pieces.append(jnp.zeros((tb, pad), dtype=jnp.float32))

    # One full-width, lane-dense, unmasked store per grid step.
    out_ref[...] = jnp.concatenate(pieces, axis=-1)


def policy_forward(x, params, eps, get_logprob=False, *, block_batch=None):
    """Pallas-backed Policy.forward. Returns (action, logprob|None, mean)."""
    batch, state_dim = x.shape
    action_dim = eps.shape[-1]
    w1, b1, w2, b2, w3, b3, w4, b4 = params

    # bf16 matmul operands pack 16 rows per sublane; keep tiles unmasked.
    bf16_weights = any(p.dtype == jnp.bfloat16 for p in (w1, w2, w3, w4))
    align = 16 if bf16_weights else 8

    # Batch tile: one big tile on single-TC chips; an even, balanced split
    # into `num_cores` steps on multi-TC chips (v7x).
    if block_batch is not None:
        tb = _round_up(block_batch, align)
    else:
        ncores = _num_tensorcores()
        if ncores >= 2 and batch >= 2 * 8 * align:
            tb = min(1024, _round_up(pl.cdiv(batch, ncores), align))
        else:
            tb = min(1024, _round_up(batch, align))

    b_pad = _round_up(batch, tb)

    # Fuse x and eps into a single (batch, state_dim + action_dim) input so
    # each grid step issues one HBM->VMEM copy instead of two narrow ones.
    # Padded rows compute finite garbage that is sliced off below.
    xe = jnp.concatenate([x, eps], axis=-1).astype(jnp.float32)
    if b_pad != batch:
        xe = jnp.pad(xe, ((0, b_pad - batch), (0, 0)))

    in_w = state_dim + action_dim
    out_w = _round_up(2 * action_dim + 1, 128)
    grid = (b_pad // tb,)

    def resident(a):
        # Full-array block with a constant index_map -> stays VMEM-resident
        # across grid steps (no per-step re-DMA of weights).
        return pl.BlockSpec(a.shape, lambda i: (0,) * a.ndim)

    in_specs = [
        pl.BlockSpec((tb, in_w), lambda i: (i, 0)),             # [x | eps]
        resident(w1), resident(b1),
        resident(w2), resident(b2),
        resident(w3), resident(b3),
        resident(w4), resident(b4),
    ]
    out_specs = pl.BlockSpec((tb, out_w), lambda i: (i, 0))

    slab = pl.pallas_call(
        functools.partial(policy_kernel,
                          state_dim=state_dim,
                          action_dim=action_dim,
                          get_logprob=bool(get_logprob)),
        grid=grid,
        in_specs=in_specs,
        out_specs=out_specs,
        out_shape=jax.ShapeDtypeStruct((b_pad, out_w), jnp.float32),
        compiler_params=pltpu.CompilerParams(
            dimension_semantics=("parallel",)),
    )(xe, w1, b1, w2, b2, w3, b3, w4, b4)

    action = slab[:batch, :action_dim]
    mean = slab[:batch, action_dim:2 * action_dim]
    logprob = slab[:batch, 2 * action_dim:2 * action_dim + 1] if get_logprob else None
    return action, logprob, mean


def init_policy_params(key, state_dim, action_dim, hidden_size):
    """PyTorch-style uniform(+-1/sqrt(fan_in)) init.

    Weights are stored (in_features, out_features) so every layer is
    y = x @ W + b.  The output head is kept fused as (hidden, 2*action_dim);
    the kernel splits mu/logstd with static slices (== .chunk(2, dim=1)).
    """
    dims = [(state_dim, hidden_size),
            (hidden_size, hidden_size),
            (hidden_size, hidden_size),
            (hidden_size, 2 * action_dim)]
    params = []
    keys = jax.random.split(key, 2 * len(dims))
    for i, (fan_in, fan_out) in enumerate(dims):
        bound = 1.0 / math.sqrt(fan_in)
        w = jax.random.uniform(keys[2 * i], (fan_in, fan_out),
                               minval=-bound, maxval=bound, dtype=jnp.float32)
        b = jax.random.uniform(keys[2 * i + 1], (1, fan_out),
                               minval=-bound, maxval=bound, dtype=jnp.float32)
        params.extend([w, b])
    return tuple(params)


def cast_matmul_weights(params, dtype):
    """Cast only the matmul weights (not biases / head math) to `dtype`."""
    w1, b1, w2, b2, w3, b3, w4, b4 = params
    return (w1.astype(dtype), b1, w2.astype(dtype), b2,
            w3.astype(dtype), b3, w4.astype(dtype), b4)


def _reference_forward(x, params, eps):
    """Pure-JAX reference of the same math (mirrors the kernel's dtypes)."""
    w1, b1, w2, b2, w3, b3, w4, b4 = params

    def dense(v, w, b):
        return jnp.dot(v.astype(w.dtype), w,
                       preferred_element_type=jnp.float32) + b

    h = jnp.maximum(dense(x, w1, b1), 0.0)
    h = jnp.maximum(dense(h, w2, b2), 0.0)
    h = jnp.maximum(dense(h, w3, b3), 0.0)
    head = dense(h, w4, b4)
    a_dim = eps.shape[-1]
    mu = head[:, :a_dim]
    logstd = jnp.clip(head[:, a_dim:], -20.0, 2.0)
    std = jnp.exp(logstd)
    x_raw = mu + std * eps
    action = jnp.tanh(x_raw)
    base_lp = -0.5 * eps * eps - logstd - 0.5 * math.log(2.0 * math.pi)
    ladj = 2.0 * (math.log(2.0) - x_raw - jax.nn.softplus(-2.0 * x_raw))
    logprob = jnp.sum(base_lp - ladj, axis=-1, keepdims=True)
    return action, logprob, jnp.tanh(mu)


if __name__ == "__main__":
    # Small shapes consistent with Policy(state_dim, action_dim, hidden_size)
    state_dim, action_dim, hidden_size = 16, 6, 32

    key = jax.random.PRNGKey(0)
    k_params, k_x, k_eps = jax.random.split(key, 3)
    params = init_policy_params(k_params, state_dim, action_dim, hidden_size)

    for batch in (4, 20):   # 20 exercises batch padding
        kx = jax.random.fold_in(k_x, batch)
        ke = jax.random.fold_in(k_eps, batch)
        x = jax.random.normal(kx, (batch, state_dim), dtype=jnp.float32)
        eps = jax.random.normal(ke, (batch, action_dim), dtype=jnp.float32)

        # --- f32 weights, training path (logprob requested)
        action, logprob, mean = policy_forward(x, params, eps, get_logprob=True)
        jax.block_until_ready((action, logprob, mean))
        ra, rl, rm = _reference_forward(x, params, eps)
        assert action.shape == (batch, action_dim)
        assert logprob.shape == (batch, 1)
        assert mean.shape == (batch, action_dim)
        assert jnp.allclose(action, ra, rtol=1e-5, atol=1e-5)
        assert jnp.allclose(logprob, rl, rtol=1e-4, atol=1e-4)
        assert jnp.allclose(mean, rm, rtol=1e-5, atol=1e-5)

        # --- f32 weights, rollout path (get_logprob=False returns None)
        a_inf, lp_none, m_inf = policy_forward(x, params, eps, get_logprob=False)
        jax.block_until_ready((a_inf, m_inf))
        assert lp_none is None
        assert jnp.allclose(a_inf, ra, rtol=1e-5, atol=1e-5)
        assert jnp.allclose(m_inf, rm, rtol=1e-5, atol=1e-5)

        # --- bf16 matmul weights (fast MXU path on v6e/v7x); head math stays f32
        params_bf16 = cast_matmul_weights(params, jnp.bfloat16)
        a2, l2, m2 = policy_forward(x, params_bf16, eps, get_logprob=True)
        jax.block_until_ready((a2, l2, m2))
        ra2, rl2, rm2 = _reference_forward(x, params_bf16, eps)
        assert jnp.allclose(a2, ra2, rtol=1e-3, atol=1e-3)
        assert jnp.allclose(l2, rl2, rtol=1e-3, atol=1e-3)
        assert jnp.allclose(m2, rm2, rtol=1e-3, atol=1e-3)

        # explicit block_batch override still works (multi-step grid)
        a3, l3, m3 = policy_forward(x, params, eps, get_logprob=True,
                                    block_batch=8)
        jax.block_until_ready((a3, l3, m3))
        assert jnp.allclose(a3, ra, rtol=1e-5, atol=1e-5)
        assert jnp.allclose(l3, rl, rtol=1e-4, atol=1e-4)
        assert jnp.allclose(m3, rm, rtol=1e-5, atol=1e-5)

    print("KERNEL_OK")
</pallas_src>

<mosaic_0001>
module attributes {stable_mosaic.version = 11 : i64} {
  func.func @policy_kernel(%arg0: i32, %arg1: memref<8x22xf32, #tpu.memory_space<vmem>>, %arg2: memref<16x32xf32, #tpu.memory_space<vmem>>, %arg3: memref<1x32xf32, #tpu.memory_space<vmem>>, %arg4: memref<32x32xf32, #tpu.memory_space<vmem>>, %arg5: memref<1x32xf32, #tpu.memory_space<vmem>>, %arg6: memref<32x32xf32, #tpu.memory_space<vmem>>, %arg7: memref<1x32xf32, #tpu.memory_space<vmem>>, %arg8: memref<32x12xf32, #tpu.memory_space<vmem>>, %arg9: memref<1x12xf32, #tpu.memory_space<vmem>>, %arg10: memref<8x128xf32, #tpu.memory_space<vmem>>) attributes {dimension_semantics = [#tpu.dimension_semantics<parallel>], iteration_bounds = array<i64: 1>, scalar_prefetch = 0 : i64, scratch_operands = 0 : i64, tpu.core_type = #tpu.core_type<tc>, window_params = [{transform_indices = @transform_0, window_bounds = array<i64: 8, 22>}, {pipeline_mode = #tpu.pipeline_mode<synchronous>, transform_indices = @transform_1, window_bounds = array<i64: 16, 32>}, {pipeline_mode = #tpu.pipeline_mode<synchronous>, transform_indices = @transform_2, window_bounds = array<i64: 1, 32>}, {pipeline_mode = #tpu.pipeline_mode<synchronous>, transform_indices = @transform_3, window_bounds = array<i64: 32, 32>}, {pipeline_mode = #tpu.pipeline_mode<synchronous>, transform_indices = @transform_4, window_bounds = array<i64: 1, 32>}, {pipeline_mode = #tpu.pipeline_mode<synchronous>, transform_indices = @transform_5, window_bounds = array<i64: 32, 32>}, {pipeline_mode = #tpu.pipeline_mode<synchronous>, transform_indices = @transform_6, window_bounds = array<i64: 1, 32>}, {pipeline_mode = #tpu.pipeline_mode<synchronous>, transform_indices = @transform_7, window_bounds = array<i64: 32, 12>}, {pipeline_mode = #tpu.pipeline_mode<synchronous>, transform_indices = @transform_8, window_bounds = array<i64: 1, 12>}, {transform_indices = @transform_9, window_bounds = array<i64: 8, 128>}]} {
    %c0 = arith.constant 0 : index
    %c0_0 = arith.constant 0 : index
    %0 = vector.load %arg1[%c0, %c0_0] : memref<8x22xf32, #tpu.memory_space<vmem>>, vector<8x22xf32>
    %1 = vector.extract_strided_slice %0 {offsets = [0, 0], sizes = [8, 16], strides = [1, 1]} : vector<8x22xf32> to vector<8x16xf32>
    %2 = vector.extract_strided_slice %0 {offsets = [0, 16], sizes = [8, 6], strides = [1, 1]} : vector<8x22xf32> to vector<8x6xf32>
    %c0_1 = arith.constant 0 : index
    %c0_2 = arith.constant 0 : index
    %3 = vector.load %arg2[%c0_1, %c0_2] : memref<16x32xf32, #tpu.memory_space<vmem>>, vector<16x32xf32>
    %cst = arith.constant dense<0.000000e+00> : vector<8x32xf32>
    %4 = tpu.matmul %1, %3, %cst {dimension_numbers = #tpu.dot_dimension_numbers<[1], [0], [0], [1], [0, 0, 1, 1], [], []>} : vector<8x16xf32>, vector<16x32xf32>, vector<8x32xf32> -> vector<8x32xf32>
    %c0_3 = arith.constant 0 : index
    %c0_4 = arith.constant 0 : index
    %5 = vector.load %arg3[%c0_3, %c0_4] : memref<1x32xf32, #tpu.memory_space<vmem>>, vector<1x32xf32>
    %6 = vector.broadcast %5 : vector<1x32xf32> to vector<8x32xf32>
    %7 = arith.addf %4, %6 : vector<8x32xf32>
    %cst_5 = arith.constant 0.000000e+00 : f32
    %8 = vector.broadcast %cst_5 : f32 to vector<8x32xf32>
    %9 = arith.maximumf %7, %8 : vector<8x32xf32>
    %c0_6 = arith.constant 0 : index
    %c0_7 = arith.constant 0 : index
    %10 = vector.load %arg4[%c0_6, %c0_7] : memref<32x32xf32, #tpu.memory_space<vmem>>, vector<32x32xf32>
    %cst_8 = arith.constant dense<0.000000e+00> : vector<8x32xf32>
    %11 = tpu.matmul %9, %10, %cst_8 {dimension_numbers = #tpu.dot_dimension_numbers<[1], [0], [0], [1], [0, 0, 1, 1], [], []>} : vector<8x32xf32>, vector<32x32xf32>, vector<8x32xf32> -> vector<8x32xf32>
    %c0_9 = arith.constant 0 : index
    %c0_10 = arith.constant 0 : index
    %12 = vector.load %arg5[%c0_9, %c0_10] : memref<1x32xf32, #tpu.memory_space<vmem>>, vector<1x32xf32>
    %13 = vector.broadcast %12 : vector<1x32xf32> to vector<8x32xf32>
    %14 = arith.addf %11, %13 : vector<8x32xf32>
    %cst_11 = arith.constant 0.000000e+00 : f32
    %15 = vector.broadcast %cst_11 : f32 to vector<8x32xf32>
    %16 = arith.maximumf %14, %15 : vector<8x32xf32>
    %c0_12 = arith.constant 0 : index
    %c0_13 = arith.constant 0 : index
    %17 = vector.load %arg6[%c0_12, %c0_13] : memref<32x32xf32, #tpu.memory_space<vmem>>, vector<32x32xf32>
    %cst_14 = arith.constant dense<0.000000e+00> : vector<8x32xf32>
    %18 = tpu.matmul %16, %17, %cst_14 {dimension_numbers = #tpu.dot_dimension_numbers<[1], [0], [0], [1], [0, 0, 1, 1], [], []>} : vector<8x32xf32>, vector<32x32xf32>, vector<8x32xf32> -> vector<8x32xf32>
    %c0_15 = arith.constant 0 : index
    %c0_16 = arith.constant 0 : index
    %19 = vector.load %arg7[%c0_15, %c0_16] : memref<1x32xf32, #tpu.memory_space<vmem>>, vector<1x32xf32>
    %20 = vector.broadcast %19 : vector<1x32xf32> to vector<8x32xf32>
    %21 = arith.addf %18, %20 : vector<8x32xf32>
    %cst_17 = arith.constant 0.000000e+00 : f32
    %22 = vector.broadcast %cst_17 : f32 to vector<8x32xf32>
    %23 = arith.maximumf %21, %22 : vector<8x32xf32>
    %c0_18 = arith.constant 0 : index
    %c0_19 = arith.constant 0 : index
    %24 = vector.load %arg8[%c0_18, %c0_19] : memref<32x12xf32, #tpu.memory_space<vmem>>, vector<32x12xf32>
    %cst_20 = arith.constant dense<0.000000e+00> : vector<8x12xf32>
    %25 = tpu.matmul %23, %24, %cst_20 {dimension_numbers = #tpu.dot_dimension_numbers<[1], [0], [0], [1], [0, 0, 1, 1], [], []>} : vector<8x32xf32>, vector<32x12xf32>, vector<8x12xf32> -> vector<8x12xf32>
    %c0_21 = arith.constant 0 : index
    %c0_22 = arith.constant 0 : index
    %26 = vector.load %arg9[%c0_21, %c0_22] : memref<1x12xf32, #tpu.memory_space<vmem>>, vector<1x12xf32>
    %27 = vector.broadcast %26 : vector<1x12xf32> to vector<8x12xf32>
    %28 = arith.addf %25, %27 : vector<8x12xf32>
    %29 = vector.extract_strided_slice %28 {offsets = [0, 0], sizes = [8, 6], strides = [1, 1]} : vector<8x12xf32> to vector<8x6xf32>
    %30 = vector.extract_strided_slice %28 {offsets = [0, 6], sizes = [8, 6], strides = [1, 1]} : vector<8x12xf32> to vector<8x6xf32>
    %cst_23 = arith.constant -2.000000e+01 : f32
    %cst_24 = arith.constant 2.000000e+00 : f32
    %31 = vector.broadcast %cst_23 : f32 to vector<8x6xf32>
    %32 = arith.maximumf %31, %30 : vector<8x6xf32>
    %33 = vector.broadcast %cst_24 : f32 to vector<8x6xf32>
    %34 = arith.minimumf %33, %32 : vector<8x6xf32>
    %35 = math.exp %34 : vector<8x6xf32>
    %36 = arith.mulf %35, %2 : vector<8x6xf32>
    %37 = arith.addf %29, %36 : vector<8x6xf32>
    %38 = math.tanh %37 : vector<8x6xf32>
    %39 = math.tanh %29 : vector<8x6xf32>
    %cst_25 = arith.constant -5.000000e-01 : f32
    %40 = vector.broadcast %cst_25 : f32 to vector<8x6xf32>
    %41 = arith.mulf %40, %2 : vector<8x6xf32>
    %42 = arith.mulf %41, %2 : vector<8x6xf32>
    %43 = arith.subf %42, %34 : vector<8x6xf32>
    %cst_26 = arith.constant 0.918938517 : f32
    %44 = vector.broadcast %cst_26 : f32 to vector<8x6xf32>
    %45 = arith.subf %43, %44 : vector<8x6xf32>
    %cst_27 = arith.constant 0.693147182 : f32
    %46 = vector.broadcast %cst_27 : f32 to vector<8x6xf32>
    %47 = arith.subf %46, %37 : vector<8x6xf32>
    %cst_28 = arith.constant -2.000000e+00 : f32
    %48 = vector.broadcast %cst_28 : f32 to vector<8x6xf32>
    %49 = arith.mulf %48, %37 : vector<8x6xf32>
    %cst_29 = arith.constant 0.000000e+00 : f32
    %50 = vector.broadcast %cst_29 : f32 to vector<8x6xf32>
    %51 = arith.maximumf %49, %50 : vector<8x6xf32>
    %52 = math.absf %49 : vector<8x6xf32>
    %cst_30 = arith.constant 0.000000e+00 : f32
    %53 = vector.broadcast %cst_30 : f32 to vector<8x6xf32>
    %54 = arith.subf %53, %52 : vector<8x6xf32>
    %55 = math.exp %54 : vector<8x6xf32>
    %56 = math.log1p %55 : vector<8x6xf32>
    %57 = arith.addf %51, %56 : vector<8x6xf32>
    %58 = arith.subf %47, %57 : vector<8x6xf32>
    %cst_31 = arith.constant 2.000000e+00 : f32
    %59 = vector.broadcast %cst_31 : f32 to vector<8x6xf32>
    %60 = arith.mulf %59, %58 : vector<8x6xf32>
    %61 = arith.subf %45, %60 : vector<8x6xf32>
    %cst_32 = arith.constant dense<0.000000e+00> : vector<8xf32>
    %62 = vector.multi_reduction <add>, %61, %cst_32 [1] : vector<8x6xf32> to vector<8xf32>
    %63 = vector.shape_cast %62 : vector<8xf32> to vector<8x1xf32>
    %cst_33 = arith.constant 0.000000e+00 : f32
    %64 = vector.broadcast %cst_33 : f32 to vector<8x115xf32>
    %65 = tpu.concatenate %38, %39, %63, %64 in 1 : vector<8x6xf32>, vector<8x6xf32>, vector<8x1xf32>, vector<8x115xf32> -> vector<8x128xf32>
    %c0_34 = arith.constant 0 : index
    %c0_35 = arith.constant 0 : index
    %66 = vector.load %arg10[%c0_34, %c0_35] : memref<8x128xf32, #tpu.memory_space<vmem>>, vector<8x128xf32>
    tpu.vector_store %arg10[%c0_34, %c0_35], %65 {strides = array<i32>} : memref<8x128xf32, #tpu.memory_space<vmem>>, vector<8x128xf32>,
    return
  }
  func.func @transform_0(%arg0: i32) -> (i32, i32) {
    %c0_i32 = arith.constant 0 : i32
    %c0_i32_0 = arith.constant 0 : i32
    return %arg0, %c0_i32 : i32, i32
  }
  func.func @transform_1(%arg0: i32) -> (i32, i32) {
    %c0_i32 = arith.constant 0 : i32
    %c0_i32_0 = arith.constant 0 : i32
    %c0_i32_1 = arith.constant 0 : i32
    return %c0_i32, %c0_i32_0 : i32, i32
  }
  func.func @transform_2(%arg0: i32) -> (i32, i32) {
    %c0_i32 = arith.constant 0 : i32
    %c0_i32_0 = arith.constant 0 : i32
    %c0_i32_1 = arith.constant 0 : i32
    return %c0_i32, %c0_i32_0 : i32, i32
  }
  func.func @transform_3(%arg0: i32) -> (i32, i32) {
    %c0_i32 = arith.constant 0 : i32
    %c0_i32_0 = arith.constant 0 : i32
    %c0_i32_1 = arith.constant 0 : i32
    return %c0_i32, %c0_i32_0 : i32, i32
  }
  func.func @transform_4(%arg0: i32) -> (i32, i32) {
    %c0_i32 = arith.constant 0 : i32
    %c0_i32_0 = arith.constant 0 : i32
    %c0_i32_1 = arith.constant 0 : i32
    return %c0_i32, %c0_i32_0 : i32, i32
  }
  func.func @transform_5(%arg0: i32) -> (i32, i32) {
    %c0_i32 = arith.constant 0 : i32
    %c0_i32_0 = arith.constant 0 : i32
    %c0_i32_1 = arith.constant 0 : i32
    return %c0_i32, %c0_i32_0 : i32, i32
  }
  func.func @transform_6(%arg0: i32) -> (i32, i32) {
    %c0_i32 = arith.constant 0 : i32
    %c0_i32_0 = arith.constant 0 : i32
    %c0_i32_1 = arith.constant 0 : i32
    return %c0_i32, %c0_i32_0 : i32, i32
  }
  func.func @transform_7(%arg0: i32) -> (i32, i32) {
    %c0_i32 = arith.constant 0 : i32
    %c0_i32_0 = arith.constant 0 : i32
    %c0_i32_1 = arith.constant 0 : i32
    return %c0_i32, %c0_i32_0 : i32, i32
  }
  func.func @transform_8(%arg0: i32) -> (i32, i32) {
    %c0_i32 = arith.constant 0 : i32
    %c0_i32_0 = arith.constant 0 : i32
    %c0_i32_1 = arith.constant 0 : i32
    return %c0_i32, %c0_i32_0 : i32, i32
  }
  func.func @transform_9(%arg0: i32) -> (i32, i32) {
    %c0_i32 = arith.constant 0 : i32
    %c0_i32_0 = arith.constant 0 : i32
    return %arg0, %c0_i32 : i32, i32
  }
}

</mosaic_0001>

<bundles_post_ra>
// kernel: tpu_custom_call.1
= control target key start
LH: loop header
LB: loop body
LE: loop exit
PB: predicated region body
PF: predicated region fallthrough
CT: control target
= control target key end

     0   :  { %14 = vsyncpa [#allocation3], 0  ;;  %s503_s0 = inlined_call_operand.hbm [shape: f32[8,22], index: 0, kind: input, shape index: {}]   ;;  %s504_s1 = inlined_call_operand.vmem [shape: f32[16,32], index: 1, kind: input, shape index: {}]   ;;  %s505_s2 = inlined_call_operand.vmem [shape: f32[1,32], index: 2, kind: input, shape index: {}]   ;;  %s506_s3 = inlined_call_operand.vmem [shape: f32[32,32], index: 3, kind: input, shape index: {}]   ;;  %s507_s4 = inlined_call_operand.vmem [shape: f32[1,32], index: 4, kind: input, shape index: {}]   ;;  %s508_s5 = inlined_call_operand.hbm [shape: f32[32,32], index: 5, kind: input, shape index: {}]   ;;  %s509_s6 = inlined_call_operand.vmem [shape: f32[1,32], index: 6, kind: input, shape index: {}]   ;;  %s510_s7 = inlined_call_operand.vmem [shape: f32[32,12], index: 7, kind: input, shape index: {}]   ;;  %s511_s8 = inlined_call_operand.vmem [shape: f32[1,12], index: 8, kind: input, shape index: {}]   ;;  %s512_s9 = inlined_call_operand.hbm [shape: f32[8,128], index: 9, kind: output, shape index: {}]  }
   0x1   :  { %15 = vsyncpa [#allocation6], 0 }
   0x2   :  { %16 = vsyncpa [#allocation4], 0  ;;  %s22_s11 = sshll.u32 %s503_s0, 4  ;;  %s382_s12 = smov [#allocation2]   ;;  %s23_s11 = int_to_ptr.hbm [resolvable:$true] %s22_s11 }
   0x3   :  { %s24_s13 = sshll.u32 %s382_s12, 4  ;;  %s40_s16 = sshll.u32 %s508_s5, 4  ;;  %s25_s13 = int_to_ptr.vmem [resolvable:$true] %s24_s13  ;;  %s41_s16 = int_to_ptr.hbm [resolvable:$true] %s40_s16 }
   0x4   :  { %27 = dma.hbm_to_vmem [thread:$0]  %s23_s11, 128, %s25_s13, [#allocation3]  }
   0x5   :  { %s383_s17 = smov [#allocation5]   ;;  %s384_s19 = smov 128  }
   0x6   :  { %s42_s18 = sshll.u32 %s383_s17, 4  ;;  %s385_s20 = smov 8   ;;  %s43_s18 = int_to_ptr.vmem [resolvable:$true] %s42_s18 }
   0x7   :  { %48 = dma.hbm_to_vmem [thread:$0]  %s41_s16, 512, %s43_s18, [#allocation6], %s384_s19, %s384_s19, %s385_s20  }
   0x8   :  { %376 = dma.done.wait [#allocation3], 128  }
   0x9   :  { %377 = vsyncadd [#allocation3], 4294967168 }
   0xa   :  { %378 = dma.done.wait [#allocation6], 512  }
   0xb   :  { %379 = vsyncadd [#allocation6], 4294966784  ;;  %v65_v0 = vld [vmem:[%s504_s1 + $0x8] sm:$0xff]  ;;  %v64_v1 = vld [vmem:[%s504_s1] sm:$0xff]  ;;  %vm70_vm0 = vcmask 130048   ;;  %vm103_vm1 = vcmask 261120  }
   0xc   :  { %88 = vmatpush.msra.mxu0 %v65_v0  ;;  %v455_v2 = vld [vmem:[#allocation2] sm:$0xff]  ;;  %v98_v3 = vld [vmem:[%s506_s3 + $0x18] sm:$0xff]  ;;  %v97_v4 = vld [vmem:[%s506_s3 + $0x10] sm:$0xff]  ;;  %s387_s22 = smov 10   ;;  %s391_s23 = smov 112   ;;  %vm242_vm3 = vcmask 48128  }
   0xd   :  { %119 = vmatpush.msra.mxu1 %v98_v3  ;;  %v96_v5 = vld [vmem:[%s506_s3 + $0x8] sm:$0xff]  ;;  %v95_v6 = vld [vmem:[%s506_s3] sm:$0xff]  ;;  %v130_v12 = vld [vmem:[#allocation5 + $0x10] sm:$0xff]  ;;  %v206_v57 = vmul.f32 -0.5, %v455_v2  ;;  %vm251_vm4 = vcmask 97280   ;;  %s392_s5 = smov [#allocation7]  }
   0xe   :  { %89 = vmatpush.msra.mxu0 %v64_v1  ;;  %v131_v7 = vld [vmem:[#allocation5 + $0x18] sm:$0xff]  ;;  %v129_v13 = vld [vmem:[#allocation5 + $0x8] sm:$0xff]  ;;  %v128_v14 = vld [vmem:[#allocation5] sm:$0xff]  ;;  %s261_s24 = sshll.u32 %s392_s5, 4  ;;  %s263_s27 = sshll.u32 %s512_s9, 4  ;;  %vm253_vm5 = vcmask 105472   ;;  %s262_s24 = int_to_ptr.vmem [resolvable:$true] %s261_s24  ;;  %s264_s27 = int_to_ptr.hbm [resolvable:$true] %s263_s27 }
   0xf   :  { %274 = vmatmul.msk.f32.vlgmr.msra.gmra.mxu0 %vm70_vm0, %v455_v2  ;;  %120 = vmatpush.msra.mxu1 %v97_v4  ;;  %v290_v8 = vld [vmem:[%s505_s2] ss:$0 sm:$0xff]  ;;  %v163_v15 = vld [vmem:[%s510_s7 + $0x18] sm:$0xff]  ;;  %s386_s2 = smov 118   ;;  %v162_v20 = vld [vmem:[%s510_s7 + $0x10] sm:$0xff]  ;;  %v207_v58 = vmul.f32 %v206_v57, %v455_v2 }
  0x10   :  { %151 = vmatpush.msra.mxu2 %v131_v7  ;;  %183 = vmatpush.msra.mxu3 %v163_v15  ;;  %v291_v16 = vld [vmem:[%s507_s4] ss:$0 sm:$0xff]  ;;  %v161_v21 = vld [vmem:[%s510_s7 + $0x8] sm:$0xff] }
  0x11   :  { %121 = vmatpush.msra.mxu1 %v96_v5  ;;  %195 = vrot.lane.b32.xlu0 %v455_v2, %s386_s2  ;;  %v160_v22 = vld [vmem:[%s510_s7] sm:$0xff]  ;;  %s389_s7 = smov 6  }
  0x12   :  { %152 = vmatpush.msra.mxu2 %v130_v12  ;;  %184 = vmatpush.msra.mxu3 %v162_v20  ;;  %v292_v23 = vld [vmem:[%s509_s6] ss:$0 sm:$0xff]  ;;  %s388_s6 = smov 122  }
  0x13   :  { %122 = vmatpush.msra.mxu1 %v95_v6  ;;  %v293_v27 = vld [vmem:[%s511_s8] ss:$0 sm:$0xff]  ;;  %s390_s8 = smov 16  }
  0x14   :  { %153 = vmatpush.msra.mxu2 %v129_v13  ;;  %185 = vmatpush.msra.mxu3 %v161_v21 }
  0x16   :  { %154 = vmatpush.msra.mxu2 %v128_v14  ;;  %186 = vmatpush.msra.mxu3 %v160_v22 }
  0x83   :  { %v196_v33 = vpop.permute.xlu0 %195 }
  0x8c   :  { %v91_v9 = vpop.f32.mrf.mxu0 }
  0x8d   :  { %v92_v10 = vadd.f32 %v290_v8, %v91_v9 }
  0x8f   :  { %v94_v11 = vmax.f32 %v92_v10, 0.0 }
  0x91   :  { %275 = vmatmul.msk.f32.vlgmr.msra.gmra.mxu1 %vm103_vm1, %v94_v11 }
 0x10e   :  { %v124_v17 = vpop.f32.mrf.mxu1 }
 0x10f   :  { %v125_v18 = vadd.f32 %v291_v16, %v124_v17 }
 0x111   :  { %v127_v19 = vmax.f32 %v125_v18, 0.0 }
 0x113   :  { %276 = vmatmul.msk.f32.vlgmr.msra.gmra.mxu2 %vm103_vm1, %v127_v19 }
 0x196   :  { %v156_v24 = vpop.f32.mrf.mxu2 }
 0x197   :  { %v157_v25 = vadd.f32 %v292_v23, %v156_v24 }
 0x199   :  { %v159_v26 = vmax.f32 %v157_v25, 0.0 }
 0x19b   :  { %277 = vmatmul.msk.f32.vlgmr.msra.gmra.mxu3 %vm103_vm1, %v159_v26 }
 0x21e   :  { %v188_v28 = vpop.f32.mrf.mxu3 }
 0x21f   :  { %v189_v29 = vadd.f32 %v293_v27, %v188_v28 }
 0x221   :  { %v191_v30 = vmax.f32 %v189_v29, -20.0 }
 0x223   :  { %v192_v31 = vmin.f32 %v191_v30, 2.0 }
 0x225   :  { %209 = vrot.lane.b32.xlu1 %v192_v31, %s387_s22  ;;  %v193_v32 = vmul.f32 1.442695, %v192_v31 }
 0x227   :  { %294 = vpow2.f32 %v193_v32 }
 0x228   :  { %296 = vtanh.f32 %v189_v29 }
 0x22d   :  { %v295_v34 = vpop.eup %294 }
 0x22e   :  { %v198_v35 = vmul.f32 %v295_v34, %v196_v33  ;;  %v297_v36 = vpop.eup %296 }
 0x230   :  { %200 = vrot.lane.b32.xlu0 %v198_v35, %s388_s6 }
 0x238   :  { %247 = vrot.lane.b32.xlu0 %v297_v36, %s389_s7 }
 0x297   :  { %v210_v59 = vpop.permute.xlu1 %209 }
 0x298   :  { %v212_v60 = vsub.f32 %v207_v58, %v210_v59 }
 0x29a   :  { %v278_v61 = vadd.f32 -0.9189385, %v212_v60 }
 0x2a2   :  { %v201_v37 = vpop.permute.xlu0 %200 }
 0x2a3   :  { %v203_v38 = vadd.f32 %v201_v37, %v189_v29 }
 0x2a5   :  { %v215_v39 = vmul.f32 -2.0, %v203_v38  ;;  %v214_v53 = vsub.f32 0.6931472, %v203_v38 }
 0x2a7   :  { %v217_v40 = vand.u32 2147483647, %v215_v39  ;;  %v216_v51 = vmax.f32 %v215_v39, 0.0 }
 0x2a9   :  { %v218_v41 = vsub.f32 0.0, %v217_v40 }
 0x2aa   :  { %v248_v4 = vpop.permute.xlu0 %247 }
 0x2ab   :  { %v219_v42 = vmul.f32 1.442695, %v218_v41 }
 0x2ad   :  { %298 = vpow2.f32 %v219_v42 }
 0x2b3   :  { %v299_v43 = vpop.eup %298 }
 0x2b4   :  { %v221_v44 = vadd.f32 1.0, %v299_v43  ;;  %v224_v45 = vmul.f32 -0.5, %v299_v43  ;;  %v227_v47 = vand.u32 2147483647, %v299_v43 }
 0x2b6   :  { %300 = vlog2.f32 %v221_v44  ;;  %v225_v46 = vadd.f32 1.0, %v224_v45  ;;  %vm228_vm2 = vcmp.lt.f32.partialorder %v227_v47, 0.0004427343 }
 0x2b7   :  { %302 = vtanh.f32 %v203_v38 }
 0x2b8   :  { %v226_v50 = vmul.f32 %v299_v43, %v225_v46 }
 0x2bc   :  { %v301_v48 = vpop.eup %300 }
 0x2bd   :  { %v223_v49 = vmul.f32 0.6931472, %v301_v48  ;;  %v303_v3 = vpop.eup %302 }
 0x2be   :  { %v250_v2 = vsel %vm242_vm3, %v303_v3, %v248_v4 }
 0x2bf   :  { %v229_v52 = vsel %vm228_vm2, %v226_v50, %v223_v49 }
 0x2c0   :  { %v230_v54 = vadd.f32 %v229_v52, %v216_v51 }
 0x2c2   :  { %v231_v55 = vsub.f32 %v214_v53, %v230_v54 }
 0x2c4   :  { %v232_v56 = vmul.f32 2.0, %v231_v55 }
 0x2c6   :  { %234 = vrot.lane.b32.xlu1 %v232_v56, %s390_s8 }
 0x338   :  { %v235_v62 = vpop.permute.xlu1 %234 }
 0x339   :  { %v237_v63 = vsub.f32 %v278_v61, %v235_v62 }
 0x33b   :  { %239 = vrot.lane.b32.xlu2 %v237_v63, %s391_s23 }
 0x395   :  { %v240_v0 = vpop.permute.xlu2 %239 }
 0x396   :  { %v243_v1 = vsel %vm242_vm3, %v240_v0, 0.0 }
 0x397   :  { %244 = vadd.xlane.f32.xlu2 %v243_v1 }
 0x40a   :  { %v245_v5 = vpop.xlane.xlu2 %244 }
 0x40b   :  { %v252_v6 = vsel %vm251_vm4, %v250_v2, %v245_v5 }
 0x40c   :  { %v254_v7 = vsel %vm253_vm5, %v252_v6, 0.0 }
 0x40d   :  { %255 = vst [vmem:[#allocation7] sm:$0xff] %v254_v7 }
 0x40e   :  { %266 = dma.vmem_to_hbm [thread:$0]  %s262_s24, 128, %s264_s27, [#allocation4]  }
 0x40f   :  { %380 = dma.done.wait [#allocation4], 128  }
 0x410   :  { %381 = vsyncadd [#allocation4], 4294967168 }
 0x411   :  { %271 = vsyncpa [#allocation3], 1 }
 0x412   :  { %272 = vsyncpa [#allocation6], 1 }
 0x413   :  { %273 = vsyncpa [#allocation4], 1 }

</bundles_post_ra>
